<compile_context>
chip_gen: v7x
topology: tpu7x:2x2x1
jax: 0.10.0
libtpu: 0.0.40
codegen_flags: <defaults>
</compile_context>

<pallas_src>
import jax
import jax.numpy as jnp
from jax.experimental import pallas as pl
from jax.experimental.pallas import tpu as pltpu


# --------------------------------------------------------------------------
# Kernel: one small matmul per lane tile.  Weff stays VMEM-resident.
# --------------------------------------------------------------------------
def _matmul_kernel(w_ref, x_ref, o_ref):
    # (A, F) @ (F, tile_n) -> (A, tile_n).  F=8 contraction on sublanes,
    # batch on the 128-lane axis -> lane-dense output stores.
    # (The MXU is barely utilized at these shapes; a handful of VPU
    # broadcast-FMAs would also work, but the fixed MXU latency is paid only
    # once because realistic batches run as a single grid step.)
    o_ref[...] = jnp.dot(
        w_ref[...], x_ref[...], preferred_element_type=jnp.float32
    ).astype(o_ref.dtype)


_SINGLE_BLOCK_COLS = 1 << 16   # up to 64K batch rows in one block (~5 MiB VMEM)
_TILE_N = 8192                 # lane-axis tile for very large batches (128-mult)


def _round_up(n, m):
    return ((n + m - 1) // m) * m


@jax.jit
def deep_rl_forward(x, w_eff):
    """Batched forward: (N, F) -> (N, A), computed lane-major inside Pallas.

    x:     (N, F) float32 activations (spectrogram + constant bias term).
    w_eff: (A, F) float32 pre-folded effective weight
           (see prepare_effective_weight); recompute only on weight updates.
    """
    N, F = x.shape
    A = w_eff.shape[0]

    if N <= _SINGLE_BLOCK_COLS:
        tile_n, Np = N, N            # one block covering the full array
    else:
        tile_n = _TILE_N
        Np = _round_up(N, tile_n)

    # One-time layout plumbing: lane-major (F, N) so the batch sits on lanes.
    # Edge padding (multi-block path only) folds into this same copy.
    x_t = x.T if Np == N else jnp.pad(x.T, ((0, 0), (0, Np - N)))

    grid = (Np // tile_n,)
    cost = pl.CostEstimate(
        flops=2 * Np * F * A,
        transcendentals=0,
        bytes_accessed=(Np * F + A * F + Np * A) * 4,
    )

    out_t = pl.pallas_call(
        _matmul_kernel,
        out_shape=jax.ShapeDtypeStruct((A, Np), jnp.float32),
        grid_spec=pltpu.PrefetchScalarGridSpec(
            num_scalar_prefetch=0,
            grid=grid,
            in_specs=[
                # Effective weight: same tiny (A, F) block every step.
                pl.BlockSpec((A, F), lambda i: (0, 0)),
                # Lane-major activation tile: F=8 on sublanes, batch on lanes.
                pl.BlockSpec((F, tile_n), lambda i: (0, i)),
            ],
            out_specs=pl.BlockSpec((A, tile_n), lambda i: (0, i)),
        ),
        compiler_params=pltpu.CompilerParams(
            dimension_semantics=("arbitrary",),
        ),
        cost_estimate=cost,
    )(w_eff, x_t)

    out_t = out_t[:, :N] if Np != N else out_t
    return out_t.T  # (N, A), matching the PyTorch module's output layout


# --------------------------------------------------------------------------
# Weight preparation (hoisted out of the per-call path; cache the result and
# recompute only when the parameters change).
# --------------------------------------------------------------------------
def prepare_effective_weight(params):
    """Fold the two bias-free linear layers into one (A, F) matrix."""
    if params["rpe_type"] == "partial":
        w2 = jnp.concatenate(
            [params["l2_weights_const"], params["l2_weights_stim"]], axis=1
        )  # (A, F)
    else:
        w2 = params["l2_weights"]  # (A, F)

    if params["tonotopy"]:
        # x @ diag(w1) @ W2.T  ->  Weff = W2 * w1 (column scale); no diag built.
        w_eff = w2 * params["l1_weights"][None, :]
    else:
        # x @ W1.T @ W2.T  ->  Weff = W2 @ W1
        w_eff = w2 @ params["l1_weights"]
    return w_eff  # (A, F)


def forward(params, x):
    """Convenience wrapper mirroring the PyTorch module's forward().

    For a real per-step RL loop (N=1), prefer a plain jnp matmul or batch
    several env steps before calling deep_rl_forward; this wrapper always
    routes through the Pallas kernel for demonstration.
    """
    w_eff = prepare_effective_weight(params)
    squeeze = x.ndim == 1
    if squeeze:
        x = x[None, :]
    out = deep_rl_forward(x, w_eff)
    return out[0] if squeeze else out


def init_params(key, rpe_type="full", tonotopy=False, num_notes=7, num_actions=2):
    """Deterministic parameter init mirroring the PyTorch __init__ (uniform [0, 0.01))."""
    F = num_notes + 1
    k1, k2, k3 = jax.random.split(key, 3)
    params = {"rpe_type": rpe_type, "tonotopy": tonotopy}
    if tonotopy:
        params["l1_weights"] = jax.random.uniform(k1, (F,), jnp.float32, 0.0, 0.01)
    else:
        # nn.Linear weight layout: (out, in)
        params["l1_weights"] = jax.random.uniform(k1, (F, F), jnp.float32, 0.0, 0.01)
    if rpe_type == "full":
        params["l2_weights"] = jax.random.uniform(
            k2, (num_actions, F), jnp.float32, 0.0, 0.01
        )  # (out, in)
    elif rpe_type == "partial":
        params["l2_weights_const"] = jax.random.uniform(
            k2, (num_actions, 1), jnp.float32, 0.0, 0.01
        )
        params["l2_weights_stim"] = jax.random.uniform(
            k3, (num_actions, num_notes), jnp.float32, 0.0, 0.01
        )
    return params


def _reference_forward(params, x):
    """Pure-JAX reference reproducing the PyTorch forward exactly."""
    if params["tonotopy"]:
        l1_out = x @ jnp.diag(params["l1_weights"])
    else:
        l1_out = x @ params["l1_weights"].T
    if params["rpe_type"] == "partial":
        w2 = jnp.concatenate(
            [params["l2_weights_const"], params["l2_weights_stim"]], axis=1
        )
    else:
        w2 = params["l2_weights"]
    return l1_out @ w2.T


if __name__ == "__main__":
    key = jax.random.PRNGKey(0)
    k_params, k_x_small, k_x_big = jax.random.split(key, 3)

    num_notes, num_actions = 7, 2
    F = num_notes + 1

    # Small per-step-style call and a batched call (many RL steps stacked).
    x_small = jax.random.normal(k_x_small, (2, F), jnp.float32)
    x_big = jax.random.normal(k_x_big, (1024, F), jnp.float32)

    ok = True
    for rpe_type in ("full", "partial"):
        for tonotopy in (False, True):
            params = init_params(
                k_params,
                rpe_type=rpe_type,
                tonotopy=tonotopy,
                num_notes=num_notes,
                num_actions=num_actions,
            )
            # Prepared once per weight update, reused across forward calls.
            w_eff = prepare_effective_weight(params)
            for x in (x_small, x_big):
                out = jax.block_until_ready(deep_rl_forward(x, w_eff))
                ref = _reference_forward(params, x)
                if out.shape != (x.shape[0], num_actions):
                    ok = False
                if not jnp.allclose(out, ref, atol=1e-5, rtol=1e-4):
                    ok = False

    if ok:
        print("KERNEL_OK")
    else:
        print("KERNEL_MISMATCH")
</pallas_src>

<mosaic_0001>
module attributes {stable_mosaic.version = 11 : i64} {
  func.func @_matmul_kernel(%arg0: i32, %arg1: memref<2x8xf32, #tpu.memory_space<vmem>>, %arg2: memref<8x2xf32, #tpu.memory_space<vmem>>, %arg3: memref<2x2xf32, #tpu.memory_space<vmem>>) attributes {dimension_semantics = [#tpu.dimension_semantics<arbitrary>], iteration_bounds = array<i64: 1>, scalar_prefetch = 0 : i64, scratch_operands = 0 : i64, tpu.core_type = #tpu.core_type<tc>, window_params = [{pipeline_mode = #tpu.pipeline_mode<synchronous>, transform_indices = @transform_0, window_bounds = array<i64: 2, 8>}, {transform_indices = @transform_1, window_bounds = array<i64: 8, 2>}, {transform_indices = @transform_2, window_bounds = array<i64: 2, 2>}]} {
    %c0 = arith.constant 0 : index
    %c0_0 = arith.constant 0 : index
    %0 = vector.load %arg1[%c0, %c0_0] : memref<2x8xf32, #tpu.memory_space<vmem>>, vector<2x8xf32>
    %c0_1 = arith.constant 0 : index
    %c0_2 = arith.constant 0 : index
    %1 = vector.load %arg2[%c0_1, %c0_2] : memref<8x2xf32, #tpu.memory_space<vmem>>, vector<8x2xf32>
    %cst = arith.constant dense<0.000000e+00> : vector<2x2xf32>
    %2 = tpu.matmul %0, %1, %cst {dimension_numbers = #tpu.dot_dimension_numbers<[1], [0], [0], [1], [0, 0, 1, 1], [], []>} : vector<2x8xf32>, vector<8x2xf32>, vector<2x2xf32> -> vector<2x2xf32>
    %c0_3 = arith.constant 0 : index
    %c0_4 = arith.constant 0 : index
    %3 = vector.load %arg3[%c0_3, %c0_4] : memref<2x2xf32, #tpu.memory_space<vmem>>, vector<2x2xf32>
    tpu.vector_store %arg3[%c0_3, %c0_4], %2 {strides = array<i32>} : memref<2x2xf32, #tpu.memory_space<vmem>>, vector<2x2xf32>,
    return
  }
  func.func @transform_0(%arg0: i32) -> (i32, i32) {
    %c0_i32 = arith.constant 0 : i32
    %c0_i32_0 = arith.constant 0 : i32
    %c0_i32_1 = arith.constant 0 : i32
    return %c0_i32, %c0_i32_0 : i32, i32
  }
  func.func @transform_1(%arg0: i32) -> (i32, i32) {
    %c0_i32 = arith.constant 0 : i32
    %c0_i32_0 = arith.constant 0 : i32
    return %c0_i32, %arg0 : i32, i32
  }
  func.func @transform_2(%arg0: i32) -> (i32, i32) {
    %c0_i32 = arith.constant 0 : i32
    %c0_i32_0 = arith.constant 0 : i32
    return %c0_i32, %arg0 : i32, i32
  }
}

</mosaic_0001>

<bundles_post_ra>
// kernel: deep_rl_forward.1
= control target key start
LH: loop header
LB: loop body
LE: loop exit
PB: predicated region body
PF: predicated region fallthrough
CT: control target
= control target key end

     0   :  { %vm13_vm0 = vcmask 64512   ;;  %v103_v0 = vmov 0.0   ;;  %vm104_vm1 = vmmov 0   ;;  %vm87_vm2 = vcmask 9216   ;;  %s129_s1 = inlined_call_operand.vmem [shape: f32[8,2], index: 1, kind: input, shape index: {}]   ;;  %s130_s0 = inlined_call_operand.vmem [shape: f32[2,8], index: 0, kind: input, shape index: {}]   ;;  %s131_s2 = inlined_call_operand.vmem [shape: f32[2,2], index: 2, kind: output, shape index: {}]  }
   0x1   :  { %96 = vmatprep.subr.mxu0 %v103_v0  ;;  %v12_v1 = vld [vmem:[%s129_s1] sm:$0xff]  ;;  %98 = vmatprep.mubr.msk.f32.mxu0 %vm104_vm1, %v103_v0 }
   0x2   :  { %v11_v2 = vld [vmem:[%s130_s0] sm:$0x3]  ;;  %97 = vmatpush3.msra.mxu0 %v12_v1 }
   0x3   :  { %99 = vmatmul.mubr.msk.f32.vlgmr.msra.gmra.mrb[0].mxu0 %vm13_vm0, %v11_v2 }
  0xd6   :  { %v83_v3 = vpop.f32.mrb[0].mxu0 }
  0xd7   :  { %88 = vst.msk [vmem:[%s131_s2] sm:$0x3] %vm87_vm2, %v83_v3  ;;  %v100_v4 = vpop.f32.mrb[1].mxu0 }

</bundles_post_ra>
